<compile_context>
chip_gen: v5e
topology: v5e:2x2
jax: 0.10.0
libtpu: 0.0.40
codegen_flags: <defaults>
</compile_context>

<pallas_src>
import jax
import jax.numpy as jnp
from jax.experimental import pallas as pl
from jax.experimental.pallas import tpu as pltpu


def _vq_kernel(e_sq_ref, codes_ref, x_ref, quant_ref):
    """Quantize one [C, tT] token tile against the full codebook.

    e_sq_ref : [K, 1]     VMEM   precomputed ||e_k||^2 (hoisted, loop-invariant)
    codes_ref: [K, C]     VMEM   full codebook (same block every step)
    x_ref    : [1, C, tT] VMEM   input tile (tokens on the lane axis)
    quant_ref: [1, C, tT] VMEM   quantized tile (output, lane-dense store)
    """
    x_tile = x_ref[0].astype(jnp.float32)        # [C, tT]
    codes = codes_ref[...].astype(jnp.float32)   # [K, C]
    K = codes.shape[0]
    tT = x_tile.shape[1]

    # Distance up to a per-token constant: argmin over K is invariant to ||x||^2,
    # so we only need ||e||^2 - 2 <e, x>.
    dots = jnp.dot(codes, x_tile, preferred_element_type=jnp.float32)      # [K, tT] MXU
    dist = e_sq_ref[...] - 2.0 * dots                                       # [K, tT]

    # First-index argmin over the code axis (matches torch.argmin tie-breaking).
    dmin = jnp.min(dist, axis=0, keepdims=True)                             # [1, tT]
    ids = jax.lax.broadcasted_iota(jnp.int32, (K, tT), 0)                   # [K, tT]
    idx = jnp.min(jnp.where(dist == dmin, ids, K), axis=0, keepdims=True)   # [1, tT]

    # Gather codebook rows with a one-hot matmul:
    #   quant[c, t] = sum_k codes[k, c] * onehot[k, t]
    onehot = (ids == idx).astype(jnp.float32)                               # [K, tT]
    quant = jax.lax.dot_general(
        codes, onehot,
        dimension_numbers=(((0,), (0,)), ((), ())),
        preferred_element_type=jnp.float32)                                 # [C, tT]

    quant_ref[0] = quant.astype(quant_ref.dtype)


def _pick_token_tile(T):
    """Largest lane-dense (multiple-of-128) tile dividing T, capped so the
    [K, tT] intermediates stay comfortably inside VMEM on all generations
    (v7x has 64 MiB/TC); fall back to the full T for small inputs."""
    for cand in (1024, 512, 256, 128):
        if T % cand == 0:
            return cand
    return T


def vector_quantizer(x, codebook, *, tT=None):
    """x: [B, C, T] float32, codebook: [K, C] float32 -> (quantized [B,C,T], loss scalar)."""
    B, C, T = x.shape
    K, Cc = codebook.shape
    assert Cc == C
    if tT is None:
        tT = _pick_token_tile(T)
    assert T % tT == 0

    # Loop-invariant ||e_k||^2 hoisted out of the grid loop (tiny XLA op).
    e_sq = jnp.sum(codebook.astype(jnp.float32) ** 2, axis=1, keepdims=True)  # [K, 1]

    quant = pl.pallas_call(
        _vq_kernel,
        out_shape=jax.ShapeDtypeStruct((B, C, T), x.dtype),
        grid_spec=pltpu.PrefetchScalarGridSpec(
            num_scalar_prefetch=0,
            grid=(B, T // tT),
            in_specs=[
                pl.BlockSpec((K, 1), lambda b, t: (0, 0)),        # ||e||^2 (same block)
                pl.BlockSpec((K, C), lambda b, t: (0, 0)),        # full codebook
                pl.BlockSpec((1, C, tT), lambda b, t: (b, 0, t)),  # token tile
            ],
            out_specs=pl.BlockSpec((1, C, tT), lambda b, t: (b, 0, t)),
        ),
        compiler_params=pltpu.CompilerParams(
            # No cross-step carry -> both grid axes are independent (megacore/2-TC friendly).
            dimension_semantics=("parallel", "parallel"),
        ),
    )(e_sq, codebook, x)

    # Forward value of mse(quant.detach(), x) + mse(quant, x.detach()) = 2*mean((quant-x)^2).
    # TODO(synk): pallas_call has no custom VJP, so gradients of `loss` through `quant`
    # (i.e. into the codebook) do not flow; forward-pass semantics only.
    loss = 2.0 * jnp.mean((quant - x) ** 2)

    # Straight-through estimator: forward value == quant, gradients flow through x.
    quantized = x + jax.lax.stop_gradient(quant - x)
    return quantized, loss


def _reference(x, codebook):
    """Pure-JAX reference mirroring the PyTorch forward (for verification)."""
    B, C, T = x.shape
    flat = jnp.transpose(x, (0, 2, 1)).reshape(-1, C)
    dist = (jnp.sum(flat**2, axis=1, keepdims=True)
            - 2.0 * flat @ codebook.T
            + jnp.sum(codebook**2, axis=1))
    idx = jnp.argmin(dist, axis=1)
    quant = jnp.transpose(codebook[idx].reshape(B, T, C), (0, 2, 1))
    loss = jnp.mean((quant - x) ** 2) * 2.0
    quantized = x + jax.lax.stop_gradient(quant - x)
    return quantized, loss


if __name__ == "__main__":
    # Module config: dim=C=16, num_codes=K=64.  Input x: [B, C, T] = [2, 16, 256]
    # (T a multiple of 128 so the token tile is fully lane-dense).
    dim, num_codes = 16, 64
    B, T = 2, 256

    key = jax.random.PRNGKey(0)
    k_x, k_e = jax.random.split(key)
    x = jax.random.normal(k_x, (B, dim, T), dtype=jnp.float32)
    # nn.Embedding weight init: uniform(-1/num_codes, 1/num_codes), shape [num_codes, dim]
    codebook = jax.random.uniform(
        k_e, (num_codes, dim), dtype=jnp.float32,
        minval=-1.0 / num_codes, maxval=1.0 / num_codes)

    quantized, loss = vector_quantizer(x, codebook)
    jax.block_until_ready((quantized, loss))

    q_ref, l_ref = _reference(x, codebook)
    assert jnp.allclose(quantized, q_ref, atol=1e-5), "quantized mismatch"
    assert jnp.allclose(loss, l_ref, atol=1e-5), "loss mismatch"

    print("KERNEL_OK")
</pallas_src>

<mosaic_0001>
module attributes {stable_mosaic.version = 11 : i64} {
  func.func @_vq_kernel(%arg0: i32, %arg1: i32, %arg2: memref<64x1xf32, #tpu.memory_space<vmem>>, %arg3: memref<64x16xf32, #tpu.memory_space<vmem>>, %arg4: memref<1x16x256xf32, #tpu.memory_space<vmem>>, %arg5: memref<1x16x256xf32, #tpu.memory_space<vmem>>) attributes {dimension_semantics = [#tpu.dimension_semantics<parallel>, #tpu.dimension_semantics<parallel>], iteration_bounds = array<i64: 2, 1>, scalar_prefetch = 0 : i64, scratch_operands = 0 : i64, tpu.core_type = #tpu.core_type<tc>, window_params = [{pipeline_mode = #tpu.pipeline_mode<synchronous>, transform_indices = @transform_0, window_bounds = array<i64: 64, 1>}, {pipeline_mode = #tpu.pipeline_mode<synchronous>, transform_indices = @transform_1, window_bounds = array<i64: 64, 16>}, {transform_indices = @transform_2, window_bounds = array<i64: 1, 16, 256>}, {transform_indices = @transform_3, window_bounds = array<i64: 1, 16, 256>}]} {
    %c0 = arith.constant 0 : index
    %c0_0 = arith.constant 0 : index
    %c0_1 = arith.constant 0 : index
    %0 = vector.load %arg4[%c0, %c0_0, %c0_1] : memref<1x16x256xf32, #tpu.memory_space<vmem>>, vector<1x16x256xf32>
    %1 = vector.shape_cast %0 : vector<1x16x256xf32> to vector<16x256xf32>
    %c0_2 = arith.constant 0 : index
    %c0_3 = arith.constant 0 : index
    %2 = vector.load %arg3[%c0_2, %c0_3] : memref<64x16xf32, #tpu.memory_space<vmem>>, vector<64x16xf32>
    %cst = arith.constant dense<0.000000e+00> : vector<64x256xf32>
    %3 = tpu.matmul %2, %1, %cst {dimension_numbers = #tpu.dot_dimension_numbers<[1], [0], [0], [1], [0, 0, 1, 1], [], []>} : vector<64x16xf32>, vector<16x256xf32>, vector<64x256xf32> -> vector<64x256xf32>
    %c0_4 = arith.constant 0 : index
    %c0_5 = arith.constant 0 : index
    %4 = vector.load %arg2[%c0_4, %c0_5] : memref<64x1xf32, #tpu.memory_space<vmem>>, vector<64x1xf32>
    %cst_6 = arith.constant 2.000000e+00 : f32
    %5 = vector.broadcast %cst_6 : f32 to vector<64x256xf32>
    %6 = arith.mulf %5, %3 : vector<64x256xf32>
    %7 = vector.broadcast %4 : vector<64x1xf32> to vector<64x256xf32>
    %8 = arith.subf %7, %6 : vector<64x256xf32>
    %cst_7 = arith.constant dense<0x7F800000> : vector<256xf32>
    %9 = vector.multi_reduction <minimumf>, %8, %cst_7 [0] : vector<64x256xf32> to vector<256xf32>
    %10 = vector.shape_cast %9 : vector<256xf32> to vector<1x256xf32>
    %11 = tpu.iota {dimensions = array<i32: 0>} : vector<64x256xi32>
    %12 = vector.broadcast %10 : vector<1x256xf32> to vector<64x256xf32>
    %13 = arith.cmpf oeq, %8, %12 : vector<64x256xf32>
    %c64_i32 = arith.constant 64 : i32
    %14 = vector.broadcast %c64_i32 : i32 to vector<64x256xi32>
    %15 = arith.select %13, %11, %14 : vector<64x256xi1>, vector<64x256xi32>
    %cst_8 = arith.constant dense<2147483647> : vector<256xi32>
    %16 = vector.multi_reduction <minsi>, %15, %cst_8 [0] : vector<64x256xi32> to vector<256xi32>
    %17 = vector.shape_cast %16 : vector<256xi32> to vector<1x256xi32>
    %18 = vector.broadcast %17 : vector<1x256xi32> to vector<64x256xi32>
    %19 = arith.cmpi eq, %11, %18 : vector<64x256xi32>
    %20 = arith.extui %19 : vector<64x256xi1> to vector<64x256xi32>
    %21 = arith.sitofp %20 : vector<64x256xi32> to vector<64x256xf32>
    %cst_9 = arith.constant dense<0.000000e+00> : vector<16x256xf32>
    %22 = tpu.matmul %2, %21, %cst_9 {dimension_numbers = #tpu.dot_dimension_numbers<[0], [0], [1], [1], [0, 1, 1, 1], [], []>} : vector<64x16xf32>, vector<64x256xf32>, vector<16x256xf32> -> vector<16x256xf32>
    %c0_10 = arith.constant 0 : index
    %c0_11 = arith.constant 0 : index
    %c0_12 = arith.constant 0 : index
    %23 = vector.load %arg5[%c0_10, %c0_11, %c0_12] : memref<1x16x256xf32, #tpu.memory_space<vmem>>, vector<1x16x256xf32>
    %24 = vector.shape_cast %23 : vector<1x16x256xf32> to vector<16x256xf32>
    %25 = vector.shape_cast %22 : vector<16x256xf32> to vector<1x16x256xf32>
    tpu.vector_store %arg5[%c0_10, %c0_11, %c0_12], %25 {strides = array<i32>} : memref<1x16x256xf32, #tpu.memory_space<vmem>>, vector<1x16x256xf32>,
    return
  }
  func.func @transform_0(%arg0: i32, %arg1: i32) -> (i32, i32) {
    %c0_i32 = arith.constant 0 : i32
    %c0_i32_0 = arith.constant 0 : i32
    %c0_i32_1 = arith.constant 0 : i32
    return %c0_i32, %c0_i32_0 : i32, i32
  }
  func.func @transform_1(%arg0: i32, %arg1: i32) -> (i32, i32) {
    %c0_i32 = arith.constant 0 : i32
    %c0_i32_0 = arith.constant 0 : i32
    %c0_i32_1 = arith.constant 0 : i32
    return %c0_i32, %c0_i32_0 : i32, i32
  }
  func.func @transform_2(%arg0: i32, %arg1: i32) -> (i32, i32, i32) {
    %c0_i32 = arith.constant 0 : i32
    %c0_i32_0 = arith.constant 0 : i32
    return %arg0, %c0_i32, %arg1 : i32, i32, i32
  }
  func.func @transform_3(%arg0: i32, %arg1: i32) -> (i32, i32, i32) {
    %c0_i32 = arith.constant 0 : i32
    %c0_i32_0 = arith.constant 0 : i32
    return %arg0, %c0_i32, %arg1 : i32, i32, i32
  }
}

</mosaic_0001>

<bundles_post_ra>
// kernel: tpu_custom_call.1
= control target key start
LH: loop header
LB: loop body
LE: loop exit
PB: predicated region body
PF: predicated region fallthrough
CT: control target
= control target key end

     0   :  { %8 = vsyncpa [#allocation3], 0  ;;  %s1254_s0 = inlined_call_operand.vmem [shape: f32[64,1], index: 0, kind: input, shape index: {}]   ;;  %s1255_s1 = inlined_call_operand.vmem [shape: f32[64,16], index: 1, kind: input, shape index: {}]   ;;  %s1256_s2 = inlined_call_operand.vmem [shape: f32[2,16,256], index: 2, kind: input, shape index: {}]   ;;  %s1257_s3 = inlined_call_operand.hbm [shape: f32[2,16,256], index: 3, kind: output, shape index: {}]  }
   0x1   :  { %10 = vsyncpa [#allocation3 + $0x1], 0  ;;  %s984_s12 = smov 0   ;;  %s986_s13 = smov 0  }
   0x2   :  { %s988_s14 = smov 0   ;;  %s990_s15 = smov 0  }
   0x3   :  { %s992_s16 = smov 0   ;;  %s994_s17 = smov 0  }
   0x4 LB: > { %s746_s18 = sadd.s32 4294967295, %s958_s17   ;;  %s747_s19 = sadd.s32 4294967294, %s958_s17   ;;  %s958_s17 = sphi %s994_s17, %s16_s17   ;;  %s954_s16 = sphi %s992_s16, %s1264_s16   ;;  %s950_s15 = sphi %s990_s15, %s1263_s15   ;;  %s946_s14 = sphi %s988_s14, %s1262_s14   ;;  %s942_s13 = sphi %s986_s13, %s1261_s13   ;;  %s938_s12 = sphi %s984_s12, %s1260_s12  }
   0x5   : > { %s28_s20 = sadd.s32 1, %s954_s16  ;;  %s107_s21 = sadd.s32 1, %s946_s14 }
   0x6   : > { %p30_p0 = scmp.ge.s32.totalorder %s28_s20, 2  ;;  %p117_p1 = scmp.ne.s32.totalorder %s946_s14, %s942_s13 }
   0x7   : > { %p118_p2 = scmp.eq.s32.totalorder %s746_s18, 1  ;;  %p123_p3 = scmp.ne.s32.totalorder %s942_s13, %s938_s12 }
   0x8   : > { %s1266_s20 = smov (%p30_p0, %s28_s20), 0  ;;  %p124_p5 = scmp.eq.s32.totalorder %s747_s19, 1 }
   0x9   : > { %p1024_p4 = por %p118_p2, %p117_p1  ;;  %s102_s23 = ssub.s32 %s954_s16, %s1266_s20 }
   0xa   : > { %p750_p6 = scmp.ge.s32.totalorder %s958_s17, 1  ;;  %p105_p7 = scmp.eq.s32.totalorder %s102_s23, 0 }
   0xb   : > { %p1031_p8 = por %p124_p5, %p123_p3  ;;  %p161_p9 = scmp.lt.s32.totalorder %s958_s17, 3 }
   0xc   : > { %s1037_s25 = scalar_select %p105_p7, %s946_s14, %s107_s21  }
   0xd   : > { %p162_p10 = pnand %p750_p6, %p161_p9 }
   0xe   : > { %p190_p11 = scmp.lt.s32.totalorder (!%p162_p10), %s950_s15, 1  ;;  %s186_s29 = sand.u32 (!%p162_p10), 1, %s942_s13  }
   0xf   : > { %165 = sbr.rel (%p162_p10) target bundleno = 400 (0x190), region = 32  ;;  %s751_s30 = sshll.u32 (!%p162_p10), %s186_s29, 5 }
  0x10   : > { %s188_s4 = scalar_lea.vmem (!%p162_p10), [#allocation2], %s751_s30  ;;  %s812_s5 = sshll.u32 (!%p162_p10), %s950_s15, 5 }
  0x11   : > { %s663_s8 = scalar_lea.hbm (!%p162_p10), %s1257_s3, %s812_s5  ;;  %s650_s11 = scalar_lea.sflag (!%p162_p10), [#allocation3], %s186_s29 }
  0x12   : > { %s666_s10 = sshll.u32 (!%p162_p10), %s663_s8, 4  ;;  %s900_s23 = scalar_lea.hbm (!%p162_p10), %s1257_s3, 64  ;;  %s667_s10 = int_to_ptr.hbm [resolvable:$true] %s666_s10 }
  0x13   : > { %s894_s18 = sshra.s32 (!%p162_p10), %s667_s10, 4  ;;  %s895_s18 = int_to_ptr.hbm [resolvable:$true] %s894_s18 }
  0x14   : > { %v960_v0 = vmov 0   ;;  %v319_v1 = vld [vmem:[%s1254_s0] sm:$0xff]  ;;  %s191_s28 = scalar_select %p190_p11, %s950_s15, 1  ;;  %v321_v2 = vld [vmem:[%s1254_s0 + $0x10] sm:$0xff]  ;;  %vm212_vm0 = vcmask 130048   ;;  %v209_v9 = vld [vmem:[%s1255_s1 + $0x28] sm:$0xff] }
  0x15   : > { %877 = vset.pattern.permute.xlu0 %v960_v0  ;;  %878 = vset.pattern.permute.xlu1 %v960_v0  ;;  %v323_v3 = vld [vmem:[%s1254_s0 + $0x20] sm:$0xff]  ;;  %v320_v10 = vld [vmem:[%s1254_s0 + $0x8] sm:$0xff]  ;;  %v210_v11 = vld [vmem:[%s1255_s1 + $0x30] sm:$0xff]  ;;  %s896_s19 = scalar_lea.hbm %s895_s18, 32  ;;  %p901_p1 = scmp.lt.s32.totalorder %s895_s18, %s1257_s3 }
  0x16   : > { %345 = vperm.xlu0 %877, %v319_v1   ;;  %879 = vset.pattern.permute.xlu2 %v960_v0  ;;  %s811_s6 = sshll.u32 %s191_s28, 5  ;;  %v204_v8 = vld [vmem:[%s1255_s1] sm:$0xff]  ;;  %v322_v12 = vld [vmem:[%s1254_s0 + $0x18] sm:$0xff]  ;;  %v324_v13 = vld [vmem:[%s1254_s0 + $0x28] sm:$0xff]  ;;  %p897_p12 = scmp.ne.s32.totalorder %s895_s18, %s896_s19 }
  0x17   : > { %355 = vperm.xlu1 %878, %v321_v2   ;;  %365 = vperm.xlu2 %879, %v323_v3   ;;  %s197_s9 = scalar_lea.vmem %s1256_s2, %s811_s6  ;;  %v205_v14 = vld [vmem:[%s1255_s1 + $0x8] sm:$0xff]  ;;  %v325_v15 = vld [vmem:[%s1254_s0 + $0x30] sm:$0xff]  ;;  %v211_v16 = vld [vmem:[%s1255_s1 + $0x38] sm:$0xff]  ;;  %p902_p2 = scmp.lt.s32.totalorder %s900_s23, %s896_s19 }
  0x18   : > { %v202_v4 = vld [vmem:[%s197_s9 + $0x10] sm:$0xff]  ;;  %v203_v5 = vld [vmem:[%s197_s9 + $0x18] sm:$0xff]  ;;  %v200_v6 = vld [vmem:[%s197_s9] sm:$0xff]  ;;  %p898_p13 = pnand %p897_p12, %p1024_p4 }
  0x19   : > { %251 = vmatpush.msra.mxu0 %v202_v4  ;;  %292 = vmatpush.msra.mxu1 %v203_v5  ;;  %v201_v7 = vld [vmem:[%s197_s9 + $0x8] sm:$0xff]  ;;  %v326_v17 = vld [vmem:[%s1254_s0 + $0x38] sm:$0xff]  ;;  %v206_v18 = vld [vmem:[%s1255_s1 + $0x10] sm:$0xff]  ;;  %s664_s9 = sshll.u32 %s188_s4, 4  ;;  %p903_p3 = por %p902_p2, %p901_p1  ;;  %s665_s9 = int_to_ptr.vmem [resolvable:$true] %s664_s9 }
  0x1a   : > { %815 = vmatpush.msra.mxu3 %v203_v5  ;;  %813 = vmatpush.msra.mxu2 %v202_v4  ;;  %v207_v19 = vld [vmem:[%s1255_s1 + $0x18] sm:$0xff]  ;;  %v208_v20 = vld [vmem:[%s1255_s1 + $0x20] sm:$0xff]  ;;  %p899_p0 = pneg %p898_p13 }
  0x1b   : > { %252 = vmatpush.msra.mxu0 %v200_v6  ;;  %293 = vmatpush.msra.mxu1 %v201_v7 }
  0x1c   : > { %816 = vmatpush.msra.mxu3 %v201_v7  ;;  %754 = vmatmul.msk.f32.vlgmr.msra.gmra.mxu0 %vm212_vm0, %v204_v8  ;;  %p904_p5 = pnand %p903_p3, %p899_p0 }
  0x1d   : > { %762 = vmatmul.msk.f32.vlgmr.msra.gmra.mxu1 %vm212_vm0, %v204_v8  ;;  %767 = vmatmul.msk.f32.vlgmr.msra.gmra.mxu3 %vm212_vm0, %v209_v9 }
  0x1e   : > { %814 = vmatpush.msra.mxu2 %v200_v6  ;;  %350 = vperm.xlu0 %877, %v320_v10  }
  0x1f   : > { %760 = vmatmul.msk.f32.vlgmr.msra.gmra.mxu2 %vm212_vm0, %v210_v11  ;;  %360 = vperm.xlu1 %878, %v322_v12  }
  0x20   : > { %370 = vperm.xlu2 %879, %v324_v13  }
  0x24   : > { %755 = vmatmul.msk.f32.gmra.mxu0 %vm212_vm0, %v205_v14 }
  0x25   : > { %763 = vmatmul.msk.f32.gmra.mxu1 %vm212_vm0, %v205_v14  ;;  %768 = vmatmul.msk.f32.gmra.mxu3 %vm212_vm0, %v210_v11 }
  0x26   : > { %375 = vperm.xlu0 %877, %v325_v15  }
  0x27   : > { %761 = vmatmul.msk.f32.gmra.mxu2 %vm212_vm0, %v211_v16  ;;  %380 = vperm.xlu1 %878, %v326_v17  }
  0x2c   : > { %756 = vmatmul.msk.f32.gmra.mxu0 %vm212_vm0, %v206_v18 }
  0x2d   : > { %764 = vmatmul.msk.f32.gmra.mxu1 %vm212_vm0, %v206_v18  ;;  %769 = vmatmul.msk.f32.gmra.mxu3 %vm212_vm0, %v211_v16 }
  0x34   : > { %757 = vmatmul.msk.f32.gmra.mxu0 %vm212_vm0, %v207_v19 }
  0x35   : > { %765 = vmatmul.msk.f32.gmra.mxu1 %vm212_vm0, %v207_v19 }
  0x3c   : > { %758 = vmatmul.msk.f32.gmra.mxu0 %vm212_vm0, %v208_v20 }
  0x3d   : > { %766 = vmatmul.msk.f32.gmra.mxu1 %vm212_vm0, %v208_v20 }
  0x44   : > { %759 = vmatmul.msk.f32.gmra.mxu0 %vm212_vm0, %v209_v9 }
  0x46   : > { %560 = vxpose.xlu2.b32.start [1/8] (short) (narrow) %v204_v8, 16 }
  0x4e   : > { %561 = vxpose.xlu2.b32.cont [2/8] (short) (narrow) %v205_v14, 16 }
  0x56   : > { %562 = vxpose.xlu2.b32.cont [3/8] (short) (narrow) %v206_v18, 16 }
  0x5e   : > { %563 = vxpose.xlu2.b32.cont [4/8] (short) (narrow) %v207_v19, 16 }
  0x66   : > { %564 = vxpose.xlu2.b32.cont [5/8] (short) (narrow) %v208_v20, 16 }
  0x6e   : > { %565 = vxpose.xlu2.b32.cont [6/8] (short) (narrow) %v209_v9, 16 }
  0x71   : > { %v366_v31 = vpop.permute.xlu2 %365 }
  0x76   : > { %566 = vxpose.xlu2.b32.cont [7/8] (short) (narrow) %v210_v11, 16 }
  0x7a   : > { %v371_v48 = vpop.permute.xlu2 %370 }
  0x7e   : > { %567 = vxpose.xlu2.b32.end [8/8] (short) (narrow) %v211_v16, 16 }
  0x88   : > { %v346_v28 = vpop.permute.xlu0 %345 }
  0x89   : > { %v356_v26 = vpop.permute.xlu1 %355 }
  0x90   : > { %v351_v37 = vpop.permute.xlu0 %350 }
  0x91   : > { %v361_v33 = vpop.permute.xlu1 %360 }
  0x98   : > { %v376_v58 = vpop.permute.xlu0 %375 }
  0x99   : > { %v254_v21 = vpop.f32.mrf.mxu0  ;;  %v381_v57 = vpop.permute.xlu1 %380 }
  0x9a   : > { %v295_v22 = vpop.f32.mrf.mxu1  ;;  %v327_v56 = vmul.f32 2.0, %v254_v21 }
  0x9b   : > { %v328_v41 = vmul.f32 2.0, %v295_v22 }
  0x9c   : > { %v1124_v6 = vsub.f32 %v346_v28, %v327_v56 }
  0x9d   : > { %v384_v49 = vsub.f32 %v346_v28, %v328_v41 }
  0xa0   : > { %v310_v25 = vpop.f32.mrf.mxu3 }
  0xa1   : > { %v257_v23 = vpop.f32.mrf.mxu0  ;;  %v338_v42 = vmul.f32 2.0, %v310_v25 }
  0xa2   : > { %v298_v24 = vpop.f32.mrf.mxu1  ;;  %v272_v38 = vpop.f32.mrf.mxu2  ;;  %v329_v0 = vmul.f32 2.0, %v257_v23 }
  0xa3   : > { %v330_v35 = vmul.f32 2.0, %v298_v24  ;;  %v1116_v52 = vsub.f32 %v371_v48, %v338_v42  ;;  %v339_v9 = vmul.f32 2.0, %v272_v38  ;;  %v425_v24 = vlaneseq }
  0xa4   : > { %v1131_v13 = vsub.f32 %v351_v37, %v329_v0 }
  0xa5   : > { %v1110_v43 = vsub.f32 %v351_v37, %v330_v35  ;;  %v1142_v23 = vsub.f32 %v376_v58, %v339_v9 }
  0xa8   : > { %v313_v30 = vpop.f32.mrf.mxu3 }
  0xa9   : > { %v260_v27 = vpop.f32.mrf.mxu0  ;;  %v340_v53 = vmul.f32 2.0, %v313_v30  ;;  %v1147_v30 = vshrl.u32 %v425_v24, 7 }
  0xaa   : > { %v301_v29 = vpop.f32.mrf.mxu1  ;;  %v331_v50 = vmul.f32 2.0, %v260_v27  ;;  %v275_v2 = vpop.f32.mrf.mxu2 }
  0xab   : > { %v332_v39 = vmul.f32 2.0, %v301_v29  ;;  %v396_v3 = vsub.f32 %v376_v58, %v340_v53  ;;  %v341_v15 = vmul.f32 2.0, %v275_v2  ;;  %v1150_v35 = vadd.s32 16, %v1147_v30 }
  0xac   : > { %v1120_v1 = vsub.f32 %v356_v26, %v331_v50  ;;  %v1153_v38 = vadd.s32 32, %v1147_v30  ;;  %v1156_v41 = vadd.s32 8, %v1147_v30  ;;  %v1160_v42 = vadd.s32 24, %v1147_v30 }
  0xad   : > { %v1112_v45 = vsub.f32 %v356_v26, %v332_v39  ;;  %v1140_v22 = vsub.f32 %v381_v57, %v341_v15 }
  0xae   : > { %v399_v14 = vmin.f32 %v1124_v6, %v1120_v1 }
  0xaf   : > { %v412_v61 = vmin.f32 %v384_v49, %v1112_v45 }
  0xb0   : > { %v316_v44 = vpop.f32.mrf.mxu3 }
  0xb1   : > { %v263_v32 = vpop.f32.mrf.mxu0  ;;  %v342_v54 = vmul.f32 2.0, %v316_v44  ;;  %v1163_v44 = vadd.s32 48, %v1147_v30 }
  0xb2   : > { %v304_v34 = vpop.f32.mrf.mxu1  ;;  %v333_v59 = vmul.f32 2.0, %v263_v32 }
  0xb3   : > { %v334_v36 = vmul.f32 2.0, %v304_v34  ;;  %v1122_v4 = vsub.f32 %v381_v57, %v342_v54 }
  0xb4   : > { %v1126_v7 = vsub.f32 %v361_v33, %v333_v59 }
  0xb5   : > { %v1108_v40 = vsub.f32 %v361_v33, %v334_v36 }
  0xb6   : > { %v400_v18 = vmin.f32 %v1131_v13, %v1126_v7 }
  0xb7   : > { %v413_v46 = vmin.f32 %v1110_v43, %v1108_v40 }
  0xb9   : > { %v266_v47 = vpop.f32.mrf.mxu0  ;;  %v415_v62 = vmin.f32 %v413_v46, %v1116_v52 }
  0xba   : > { %v307_v51 = vpop.f32.mrf.mxu1  ;;  %v335_v60 = vmul.f32 2.0, %v266_v47 }
  0xbb   : > { %v336_v55 = vmul.f32 2.0, %v307_v51  ;;  %v417_v10 = vmin.f32 %v415_v62, %v1122_v4 }
  0xbc   : > { %v1128_v8 = vsub.f32 %v366_v31, %v335_v60 }
  0xbd   : > { %v392_v63 = vsub.f32 %v366_v31, %v336_v55 }
  0xbe   : > { %v401_v19 = vmin.f32 %v399_v14, %v1128_v8 }
  0xbf   : > { %v414_v5 = vmin.f32 %v412_v61, %v392_v63 }
  0xc0   : > { %v403_v27 = vmin.f32 %v401_v19, %v1142_v23 }
  0xc1   : > { %v416_v11 = vmin.f32 %v414_v5, %v396_v3  ;;  %v269_v12 = vpop.f32.mrf.mxu0 }
  0xc2   : > { %v337_v16 = vmul.f32 2.0, %v269_v12 }
  0xc3   : > { %v418_v17 = vmin.f32 %v416_v11, %v417_v10 }
  0xc4   : > { %v1138_v20 = vsub.f32 %v371_v48, %v337_v16  ;;  %v1168_v48 = vadd.s32 40, %v1147_v30 }
  0xc5   : > { %v419_v21 = vrot.slane %v418_v17, 4 }
  0xc6   : > { %v402_v25 = vmin.f32 %v400_v18, %v1138_v20 }
  0xc7   : > { %v420_v26 = vmin.f32 %v418_v17, %v419_v21 }
  0xc8   : > { %v404_v28 = vmin.f32 %v402_v25, %v1140_v22  ;;  %v961_v25 = vmov 1.0  }
  0xc9   : > { %v421_v29 = vrot.slane %v420_v26, 2 }
  0xca   : > { %v405_v31 = vmin.f32 %v403_v27, %v404_v28 }
  0xcb   : > { %v422_v32 = vmin.f32 %v420_v26, %v421_v29 }
  0xcc   : > { %v406_v33 = vrot.slane %v405_v31, 4 }
  0xcd   : > { %v423_v34 = vrot.slane %v422_v32, 1 }
  0xce   : > { %v407_v36 = vmin.f32 %v405_v31, %v406_v33 }
  0xcf   : > { %v424_v37 = vmin.f32 %v422_v32, %v423_v34 }
  0xd0   : > { %v408_v39 = vrot.slane %v407_v36, 2 }
  0xd1   : > { %vm435_vm1 = vcmp.eq.f32.partialorder %v384_v49, %v424_v37  ;;  %vm439_vm2 = vcmp.eq.f32.partialorder %v1112_v45, %v424_v37  ;;  %vm443_vm3 = vcmp.eq.f32.partialorder %v392_v63, %v424_v37  ;;  %vm437_vm5 = vcmp.eq.f32.partialorder %v1110_v43, %v424_v37 }
  0xd2   : > { %v451_v46 = vsel %vm435_vm1, %v1147_v30, 64  ;;  %v455_v47 = vsel %vm439_vm2, %v1150_v35, 64  ;;  %v409_v50 = vmin.f32 %v407_v36, %v408_v39  ;;  %vm441_vm6 = vcmp.eq.f32.partialorder %v1108_v40, %v424_v37 }
  0xd3   : > { %vm489_vm4 = vcmp.lt.s32.totalorder %v451_v46, %v455_v47  ;;  %vm447_vm7 = vcmp.eq.f32.partialorder %v396_v3, %v424_v37  ;;  %v459_v45 = vsel %vm443_vm3, %v1153_v38, 64  ;;  %v453_v51 = vsel %vm437_vm5, %v1156_v41, 64 }
  0xd4   : > { %v490_v49 = vsel %vm489_vm4, %v451_v46, %v455_v47  ;;  %v410_v53 = vrot.slane %v409_v50, 1  ;;  %vm445_vm9 = vcmp.eq.f32.partialorder %v1116_v52, %v424_v37  ;;  %v457_v54 = vsel %vm441_vm6, %v1160_v42, 64 }
  0xd5   : > { %vm493_vm8 = vcmp.lt.s32.totalorder %v490_v49, %v459_v45  ;;  %vm491_vm10 = vcmp.lt.s32.totalorder %v453_v51, %v457_v54  ;;  %v463_v56 = vsel %vm447_vm7, %v1163_v44, 64  ;;  %v1178_v40 = vadd.s32 56, %v1147_v30 }
  0xd6   : > { %v494_v55 = vsel %vm493_vm8, %v490_v49, %v459_v45  ;;  %v411_v57 = vmin.f32 %v409_v50, %v410_v53  ;;  %v492_v43 = vsel %vm491_vm10, %v453_v51, %v457_v54  ;;  %vm449_vm12 = vcmp.eq.f32.partialorder %v1122_v4, %v424_v37 }
  0xd7   : > { %vm497_vm11 = vcmp.lt.s32.totalorder %v494_v55, %v463_v56  ;;  %v461_v58 = vsel %vm445_vm9, %v1168_v48, 64  ;;  %v465_v63 = vsel %vm449_vm12, %v1178_v40, 64 }
  0xd8   : > { %vm434_vm13 = vcmp.eq.f32.partialorder %v1124_v6, %v411_v57  ;;  %vm436_vm14 = vcmp.eq.f32.partialorder %v1131_v13, %v411_v57  ;;  %vm438_vm15 = vcmp.eq.f32.partialorder %v1120_v1, %v411_v57  ;;  %vm440_vm0 = vcmp.eq.f32.partialorder %v1126_v7, %v411_v57 }
  0xd9   : > { %vm442_vm1 = vcmp.eq.f32.partialorder %v1128_v8, %v411_v57  ;;  %vm444_vm2 = vcmp.eq.f32.partialorder %v1138_v20, %v411_v57  ;;  %vm495_vm3 = vcmp.lt.s32.totalorder %v492_v43, %v461_v58  ;;  %v450_v52 = vsel %vm434_vm13, %v1147_v30, 64 }
  0xda   : > { %v452_v59 = vsel %vm436_vm14, %v1156_v41, 64  ;;  %v454_v60 = vsel %vm438_vm15, %v1150_v35, 64  ;;  %v456_v61 = vsel %vm440_vm0, %v1160_v42, 64  ;;  %v498_v62 = vsel %vm497_vm11, %v494_v55, %v463_v56 }
  0xdb   : > { %vm446_vm4 = vcmp.eq.f32.partialorder %v1142_v23, %v411_v57  ;;  %vm448_vm5 = vcmp.eq.f32.partialorder %v1140_v22, %v411_v57  ;;  %v458_v0 = vsel %vm442_vm1, %v1153_v38, 64  ;;  %vm466_vm6 = vcmp.lt.s32.totalorder %v450_v52, %v454_v60 }
  0xdc   : > { %vm468_vm7 = vcmp.lt.s32.totalorder %v452_v59, %v456_v61  ;;  %v496_v1 = vsel %vm495_vm3, %v492_v43, %v461_v58  ;;  %v460_v2 = vsel %vm444_vm2, %v1168_v48, 64  ;;  %v467_v3 = vsel %vm466_vm6, %v450_v52, %v454_v60 }
  0xdd   : > { %v469_v5 = vsel %vm468_vm7, %v452_v59, %v456_v61  ;;  %vm499_vm8 = vcmp.lt.s32.totalorder %v496_v1, %v465_v63  ;;  %v462_v6 = vsel %vm446_vm4, %v1163_v44, 64  ;;  %vm470_vm9 = vcmp.lt.s32.totalorder %v467_v3, %v458_v0 }
  0xde   : > { %vm472_vm10 = vcmp.lt.s32.totalorder %v469_v5, %v460_v2  ;;  %v500_v7 = vsel %vm499_vm8, %v496_v1, %v465_v63  ;;  %v464_v8 = vsel %vm448_vm5, %v1178_v40, 64  ;;  %v471_v9 = vsel %vm470_vm9, %v467_v3, %v458_v0 }
  0xdf   : > { %v473_v4 = vsel %vm472_vm10, %v469_v5, %v460_v2  ;;  %vm501_vm11 = vcmp.lt.s32.totalorder %v498_v62, %v500_v7  ;;  %vm474_vm12 = vcmp.lt.s32.totalorder %v471_v9, %v462_v6  ;;  %v576_v27 = vpop.trf.xlu2 }
  0xe0   : > { %vm476_vm13 = vcmp.lt.s32.totalorder %v473_v4, %v464_v8  ;;  %v502_v10 = vsel %vm501_vm11, %v498_v62, %v500_v7  ;;  %v475_v11 = vsel %vm474_vm12, %v471_v9, %v462_v6 }
  0xe1   : > { %v477_v12 = vsel %vm476_vm13, %v473_v4, %v464_v8  ;;  %v503_v13 = vrot.slane %v502_v10, 4 }
  0xe2   : > { %vm478_vm14 = vcmp.lt.s32.totalorder %v475_v11, %v477_v12 }
  0xe3   : > { %v479_v14 = vsel %vm478_vm14, %v475_v11, %v477_v12  ;;  %vm504_vm15 = vcmp.lt.s32.totalorder %v502_v10, %v503_v13 }
  0xe4   : > { %v480_v15 = vrot.slane %v479_v14, 4  ;;  %v505_v16 = vsel %vm504_vm15, %v502_v10, %v503_v13 }
  0xe5   : > { %v506_v17 = vrot.slane %v505_v16, 2 }
  0xe6   : > { %vm481_vm0 = vcmp.lt.s32.totalorder %v479_v14, %v480_v15 }
  0xe7   : > { %v482_v18 = vsel %vm481_vm0, %v479_v14, %v480_v15  ;;  %vm507_vm1 = vcmp.lt.s32.totalorder %v505_v16, %v506_v17  ;;  %v577_v28 = vpop.trf.xlu2 }
  0xe8   : > { %v483_v19 = vrot.slane %v482_v18, 2  ;;  %v508_v20 = vsel %vm507_vm1, %v505_v16, %v506_v17 }
  0xe9   : > { %v509_v21 = vrot.slane %v508_v20, 1 }
  0xea   : > { %vm484_vm2 = vcmp.lt.s32.totalorder %v482_v18, %v483_v19 }
  0xeb   : > { %v485_v22 = vsel %vm484_vm2, %v482_v18, %v483_v19  ;;  %vm510_vm3 = vcmp.lt.s32.totalorder %v508_v20, %v509_v21  ;;  %vm592_vm2 = vcmask 523264  }
  0xec   : > { %v486_v23 = vrot.slane %v485_v22, 1  ;;  %v511_v24 = vsel %vm510_vm3, %v508_v20, %v509_v21 }
  0xed   : > { %vm527_vm4 = vcmp.eq.s32.totalorder %v1178_v40, %v511_v24  ;;  %vm525_vm6 = vcmp.eq.s32.totalorder %v1163_v44, %v511_v24  ;;  %vm523_vm8 = vcmp.eq.s32.totalorder %v1168_v48, %v511_v24  ;;  %vm521_vm10 = vcmp.eq.s32.totalorder %v1153_v38, %v511_v24 }
  0xee   : > { %vm487_vm5 = vcmp.lt.s32.totalorder %v485_v22, %v486_v23  ;;  %796 = vmatpush.msk.msrb.mxu3 %vm527_vm4, %v961_v25  ;;  %vm519_vm12 = vcmp.eq.s32.totalorder %v1160_v42, %v511_v24  ;;  %vm517_vm14 = vcmp.eq.s32.totalorder %v1150_v35, %v511_v24  ;;  %vm515_vm0 = vcmp.eq.s32.totalorder %v1156_v41, %v511_v24 }
  0xef   : > { %v488_v26 = vsel %vm487_vm5, %v485_v22, %v486_v23  ;;  %vm513_vm3 = vcmp.eq.s32.totalorder %v1147_v30, %v511_v24 }
  0xf0   : > { %797 = vmatpush.msk.msrb.mxu3 %vm525_vm6, %v961_v25  ;;  %vm526_vm7 = vcmp.eq.s32.totalorder %v1178_v40, %v488_v26  ;;  %vm524_vm9 = vcmp.eq.s32.totalorder %v1163_v44, %v488_v26  ;;  %vm522_vm11 = vcmp.eq.s32.totalorder %v1168_v48, %v488_v26  ;;  %vm520_vm13 = vcmp.eq.s32.totalorder %v1153_v38, %v488_v26 }
  0xf1   : > { %786 = vmatpush.msk.msrb.mxu2 %vm526_vm7, %v961_v25  ;;  %vm518_vm15 = vcmp.eq.s32.totalorder %v1160_v42, %v488_v26  ;;  %vm516_vm1 = vcmp.eq.s32.totalorder %v1150_v35, %v488_v26  ;;  %vm514_vm4 = vcmp.eq.s32.totalorder %v1156_v41, %v488_v26  ;;  %vm512_vm5 = vcmp.eq.s32.totalorder %v1147_v30, %v488_v26 }
  0xf2   : > { %798 = vmatpush.msk.msrb.mxu3 %vm523_vm8, %v961_v25 }
  0xf3   : > { %787 = vmatpush.msk.msrb.mxu2 %vm524_vm9, %v961_v25 }
  0xf4   : > { %799 = vmatpush.msk.msrb.mxu3 %vm521_vm10, %v961_v25 }
  0xf5   : > { %788 = vmatpush.msk.msrb.mxu2 %vm522_vm11, %v961_v25 }
  0xf6   : > { %800 = vmatpush.msk.msrb.mxu3 %vm519_vm12, %v961_v25 }
  0xf7   : > { %789 = vmatpush.msk.msrb.mxu2 %vm520_vm13, %v961_v25 }
  0xf8   : > { %801 = vmatpush.msk.msrb.mxu3 %vm517_vm14, %v961_v25 }
  0xf9   : > { %790 = vmatpush.msk.msrb.mxu2 %vm518_vm15, %v961_v25 }
  0xfa   : > { %802 = vmatpush.msk.msrb.mxu3 %vm515_vm0, %v961_v25 }
  0xfb   : > { %791 = vmatpush.msk.msrb.mxu2 %vm516_vm1, %v961_v25 }
  0xfc   : > { %803 = vmatpush.msk.msrb.mxu3 %vm513_vm3, %v961_v25 }
  0xfd   : > { %792 = vmatpush.msk.msrb.mxu2 %vm514_vm4, %v961_v25  ;;  %804 = vmatmul.msk.f32.vlgmr.msrb.gmra.mxu3 %vm592_vm2, %v576_v27 }
  0xff   : > { %793 = vmatpush.msk.msrb.mxu2 %vm512_vm5, %v961_v25 }
 0x100   : > { %794 = vmatmul.msk.f32.vlgmr.msrb.gmra.mxu2 %vm592_vm2, %v576_v27 }
 0x105   : > { %805 = vmatmul.msk.f32.gmra.mxu3 %vm592_vm2, %v577_v28 }
 0x108   : > { %795 = vmatmul.msk.f32.gmra.mxu2 %vm592_vm2, %v577_v28 }
 0x180   : > { %v639_v29 = vpop.f32.mrf.mxu3 }
 0x181   : > { %646 = vst [vmem:[%s188_s4 + $0x8] sm:$0xff] %v639_v29 }
 0x183   : > { %v616_v31 = vpop.f32.mrf.mxu2 }
 0x184   : > { %645 = vst [vmem:[%s188_s4] sm:$0xff] %v616_v31 }
 0x188   : > { %v642_v30 = vpop.f32.mrf.mxu3 }
 0x189   : > { %648 = vst [vmem:[%s188_s4 + $0x18] sm:$0xff] %v642_v30 }
 0x18b   : > { %v619_v32 = vpop.f32.mrf.mxu2 }
 0x18c   : > { %647 = vst [vmem:[%s188_s4 + $0x10] sm:$0xff] %v619_v32 }
 0x18d   : > { %907 = shalt.err (!%p904_p5)
}
 0x18e   : > { %s962_s28 = smov 256   ;;  %s963_s29 = smov 16  }
 0x18f   : > { %817 = dma.vmem_to_hbm [thread:$0]  (%p1024_p4), %s665_s9, 512, %s667_s10, %s650_s11, %s962_s28, %s962_s28, %s963_s29  }
 0x190 PF: > { %p823_p6 = scmp.ge.s32.totalorder %s958_s17, 2  ;;  %s681_s30 = sand.u32 1, %s938_s12  }
 0x191   : > { %s682_s4 = scalar_lea.sflag [#allocation3], %s681_s30 }
 0x192   : > { %p820_p7 = pnand %p823_p6, %p1031_p8 }
 0x194   : > { %p821_p9 = pneg %p820_p7 }
 0x196   : > { %933 = dma.done.wait (%p821_p9), %s682_s4, 512  }
 0x197   : > { %935 = vsyncadd (%p821_p9), %s682_s4, 4294966784  ;;  %s16_s17 = sadd.s32 1, %s958_s17   ;;  %s1260_s12 = smov %s942_s13 }
 0x198   : > { %p13_p10 = scmp.ge.s32.totalorder %s16_s17, 4   ;;  %s1261_s13 = smov %s946_s14 }
 0x199   : > { %s1262_s14 = smov %s1037_s25  ;;  %s1263_s15 = smov %s954_s16 }
 0x19a   : > { %s1264_s16 = smov %s1266_s20  ;;  %15 = sbr.rel (!%p13_p10) target bundleno = 4 (0x4), region = 67 }
 0x19f   :  { %688 = vsyncpa [#allocation3], 1 }
 0x1a0   :  { %690 = vsyncpa [#allocation3 + $0x1], 1 }

</bundles_post_ra>
